<compile_context>
chip_gen: v6e
topology: v6e:2x2x1
jax: 0.10.0
libtpu: 0.0.40
codegen_flags: <defaults>
</compile_context>

<pallas_src>
import jax
import jax.numpy as jnp
from jax.experimental import pallas as pl
from jax.experimental.pallas import tpu as pltpu


LANE = 128      # TPU lane width: feature dims are zero-padded to this
SUBLANE = 16    # bf16 sublane packing: batch tiles are multiples of this


def _round_up(x, m):
    return (x + m - 1) // m * m


def final_nonlinear_kernel(in_ref, st_ref,
                           w1a_ref, w1b_ref, b1_ref,
                           w2_ref, b2_ref,
                           w3_ref, b3_ref,
                           w4_ref, b4_ref,
                           o_ref):
    """Fused MLP: Linear -> ReLU -> Linear -> ReLU -> Linear -> ReLU -> Linear.

    torch.cat([inputs, static], 1) @ W1 == inputs @ W1[:d_in] + static @ W1[d_in:], so the
    concat is fused as two narrow-K dots.  Dots use bf16 operands with f32 MXU accumulation;
    bias adds happen in f32, ReLUs in bf16.

    VMEM note (corrected accounting): the (tb, 128) intermediates are NOT vreg-resident for
    tb >= ~64; the compiler stages them in VMEM scratch (~2-3 x tb*128*4 B).  That scratch is
    budgeted when choosing the batch tile / vmem_limit_bytes in the wrapper.
    """
    xi = in_ref[...].astype(jnp.bfloat16)   # cast in-kernel; inputs arrive in f32
    xs = st_ref[...].astype(jnp.bfloat16)
    h = (jnp.dot(xi, w1a_ref[...], preferred_element_type=jnp.float32)
         + jnp.dot(xs, w1b_ref[...], preferred_element_type=jnp.float32)
         + b1_ref[...])
    h = jnp.maximum(h.astype(jnp.bfloat16), 0.0)
    h = jnp.dot(h, w2_ref[...], preferred_element_type=jnp.float32) + b2_ref[...]
    h = jnp.maximum(h.astype(jnp.bfloat16), 0.0)
    h = jnp.dot(h, w3_ref[...], preferred_element_type=jnp.float32) + b3_ref[...]
    h = jnp.maximum(h.astype(jnp.bfloat16), 0.0)
    y = jnp.dot(h, w4_ref[...], preferred_element_type=jnp.float32) + b4_ref[...]
    o_ref[...] = y.astype(o_ref.dtype)      # bf16, lane-dense (128-wide) store


def prepare_params(params, d_in, hidden_dim, output_dim):
    """Split W1 at the inputs/static boundary, zero-pad feature dims to the lane width and
    cast weights to bf16 (biases stay f32).  Done once, outside the hot path.  Padded weight
    rows/cols and padded biases are exactly zero, so padded hidden/output lanes stay zero
    through the ReLUs and are sliced away in the wrapper."""
    assert len(params) == 4, "this kernel implements the default num_layers=3 topology"
    (w1, b1), (w2, b2), (w3, b3), (w4, b4) = params
    h_pad = _round_up(hidden_dim, LANE)
    o_pad = _round_up(output_dim, LANE)

    def pad(a, rows, cols):
        return jnp.pad(a, ((0, rows - a.shape[0]), (0, cols - a.shape[1])))

    w1a = pad(w1[:d_in], d_in, h_pad).astype(jnp.bfloat16)
    w1b = pad(w1[d_in:], w1.shape[0] - d_in, h_pad).astype(jnp.bfloat16)
    b1p = pad(b1, 1, h_pad)
    w2p = pad(w2, h_pad, h_pad).astype(jnp.bfloat16)
    b2p = pad(b2, 1, h_pad)
    w3p = pad(w3, h_pad, h_pad).astype(jnp.bfloat16)
    b3p = pad(b3, 1, h_pad)
    w4p = pad(w4, h_pad, o_pad).astype(jnp.bfloat16)
    b4p = pad(b4, 1, o_pad)
    return (w1a, w1b, b1p, w2p, b2p, w3p, b3p, w4p, b4p)


def final_nonlinear(inputs, static, prepared, output_dim, *, batch_tile=2048):
    """inputs: [B, d_in] f32, static: [B, d_static] f32. Returns [B, output_dim] f32."""
    w1a, w1b, b1, w2, b2, w3, b3, w4, b4 = prepared
    B, d_in = inputs.shape
    d_st = static.shape[1]
    h_pad = w2.shape[0]
    o_pad = w4.shape[1]

    # Batch tiling:
    #  * large default tile (2048) amortizes the ~0.35 us fixed grid-step overhead; per-block
    #    VMEM at tb=2048 is ~5-6 MiB (inputs/out double buffers + ~2-3x tb*128*4 B compiler
    #    activation scratch + ~0.2 MiB weights) -> fits every generation's scoped VMEM.
    #  * at least 2 grid blocks whenever B allows it, so "parallel" keeps both v7x TCs busy.
    #  * tile is a multiple of 16 rows (bf16 sublane packing); grid uses cdiv, so the last
    #    block may be partial -- Pallas reads only the valid rows and masks the out-of-bounds
    #    output rows on store (garbage rows only flow through matmul/bias/ReLU, never stored).
    tb = max(SUBLANE, min(batch_tile, _round_up(pl.cdiv(B, 2), SUBLANE)))
    num_blocks = pl.cdiv(B, tb)

    # Weights / biases: constant block index -> DMA'd once, VMEM-resident across the grid.
    const = lambda shape: pl.BlockSpec(shape, lambda i: (0,) * len(shape))

    flops = 2 * B * (d_in * h_pad + d_st * h_pad + 2 * h_pad * h_pad + h_pad * o_pad)
    bytes_accessed = (B * (d_in + d_st) * 4                                     # f32 inputs
                      + (w1a.size + w1b.size + w2.size + w3.size + w4.size) * 2  # bf16 weights
                      + (b1.size + b2.size + b3.size + b4.size) * 4              # f32 biases
                      + B * o_pad * 2)                                           # bf16 output

    out = pl.pallas_call(
        final_nonlinear_kernel,
        # bf16, 128-lane-padded output: lane-dense unmasked stores, half the HBM writeback
        # of an f32 output (writeback is the dominant memory stream at hidden=32).
        out_shape=jax.ShapeDtypeStruct((B, o_pad), jnp.bfloat16),
        grid=(num_blocks,),
        in_specs=[
            pl.BlockSpec((tb, d_in), lambda i: (i, 0)),
            pl.BlockSpec((tb, d_st), lambda i: (i, 0)),
            const(w1a.shape), const(w1b.shape), const(b1.shape),
            const(w2.shape), const(b2.shape),
            const(w3.shape), const(b3.shape),
            const(w4.shape), const(b4.shape),
        ],
        out_specs=pl.BlockSpec((tb, o_pad), lambda i: (i, 0)),
        compiler_params=pltpu.CompilerParams(
            dimension_semantics=("parallel",),       # shard batch tiles across TCs on v7x
            vmem_limit_bytes=32 * 1024 * 1024,       # headroom for big tiles on v5e (16 MiB default)
        ),
        cost_estimate=pl.CostEstimate(flops=flops, transcendentals=0,
                                      bytes_accessed=bytes_accessed),
    )(inputs, static, w1a, w1b, b1, w2, b2, w3, b3, w4, b4)

    return out[:, :output_dim].astype(jnp.float32)


def init_params(key, input_dim, hidden_dim, output_dim, num_layers=3):
    """Deterministic param init matching the module's layer shapes (num_layers=3).
    Weights stored [in_features, out_features]; biases [1, out_features]."""
    assert num_layers == 3, "script instantiates the default num_layers=3 topology"
    dims = [(input_dim, hidden_dim),
            (hidden_dim, hidden_dim),
            (hidden_dim, hidden_dim),
            (hidden_dim, output_dim)]
    params = []
    for din, dout in dims:
        kw, kb, key = jax.random.split(key, 3)
        scale = 1.0 / jnp.sqrt(jnp.float32(din))
        w = jax.random.uniform(kw, (din, dout), jnp.float32, -scale, scale)
        b = jax.random.uniform(kb, (1, dout), jnp.float32, -scale, scale)
        params.append((w, b))
    return params


def reference_forward(inputs, static, params):
    """Pure-JAX (f32) reference of the PyTorch forward."""
    h = jnp.concatenate([inputs, static], axis=1)
    (w1, b1), (w2, b2), (w3, b3), (w4, b4) = params
    h = h @ w1 + b1
    h = jnp.maximum(h, 0.0) @ w2 + b2
    h = jnp.maximum(h, 0.0) @ w3 + b3
    h = jnp.maximum(h, 0.0) @ w4 + b4
    return h


if __name__ == "__main__":
    # Small shapes implied by the forward: inputs [B, d_in], static [B, d_static],
    # input_dim = d_in + d_static (dim of the concatenated tensor fed to Linear #1).
    # B=40 exercises both the multi-block grid (2 blocks) and the masked partial last block.
    B, d_in, d_static = 40, 20, 12
    input_dim = d_in + d_static          # 32
    hidden_dim = 32
    output_dim = 16

    key = jax.random.PRNGKey(0)
    k_in, k_st, k_par = jax.random.split(key, 3)
    inputs = jax.random.normal(k_in, (B, d_in), jnp.float32)
    static = jax.random.normal(k_st, (B, d_static), jnp.float32)  # stands in for self.static
    params = init_params(k_par, input_dim, hidden_dim, output_dim, num_layers=3)

    prepared = prepare_params(params, d_in, hidden_dim, output_dim)
    out = final_nonlinear(inputs, static, prepared, output_dim)
    out = jax.block_until_ready(out)

    ref = reference_forward(inputs, static, params)
    assert out.shape == (B, output_dim)
    # bf16 MXU operands + bf16 activations/output (f32 accumulation) vs. pure-f32 reference
    # -> loosened tolerance; validate against real value ranges before tightening.
    assert jnp.allclose(out, ref, atol=5e-2, rtol=5e-2), "mismatch vs pure-JAX reference"

    print("KERNEL_OK")
</pallas_src>

<mosaic_0001>
module attributes {stable_mosaic.version = 11 : i64} {
  func.func @final_nonlinear_kernel(%arg0: i32, %arg1: memref<32x20xf32, #tpu.memory_space<vmem>>, %arg2: memref<32x12xf32, #tpu.memory_space<vmem>>, %arg3: memref<20x128xbf16, #tpu.memory_space<vmem>>, %arg4: memref<12x128xbf16, #tpu.memory_space<vmem>>, %arg5: memref<1x128xf32, #tpu.memory_space<vmem>>, %arg6: memref<128x128xbf16, #tpu.memory_space<vmem>>, %arg7: memref<1x128xf32, #tpu.memory_space<vmem>>, %arg8: memref<128x128xbf16, #tpu.memory_space<vmem>>, %arg9: memref<1x128xf32, #tpu.memory_space<vmem>>, %arg10: memref<128x128xbf16, #tpu.memory_space<vmem>>, %arg11: memref<1x128xf32, #tpu.memory_space<vmem>>, %arg12: memref<32x128xbf16, #tpu.memory_space<vmem>>) attributes {dimension_semantics = [#tpu.dimension_semantics<parallel>], iteration_bounds = array<i64: 2>, scalar_prefetch = 0 : i64, scratch_operands = 0 : i64, tpu.core_type = #tpu.core_type<tc>, window_params = [{transform_indices = @transform_0, window_bounds = array<i64: 32, 20>}, {transform_indices = @transform_1, window_bounds = array<i64: 32, 12>}, {pipeline_mode = #tpu.pipeline_mode<synchronous>, transform_indices = @transform_2, window_bounds = array<i64: 20, 128>}, {pipeline_mode = #tpu.pipeline_mode<synchronous>, transform_indices = @transform_3, window_bounds = array<i64: 12, 128>}, {pipeline_mode = #tpu.pipeline_mode<synchronous>, transform_indices = @transform_4, window_bounds = array<i64: 1, 128>}, {pipeline_mode = #tpu.pipeline_mode<synchronous>, transform_indices = @transform_5, window_bounds = array<i64: 128, 128>}, {pipeline_mode = #tpu.pipeline_mode<synchronous>, transform_indices = @transform_6, window_bounds = array<i64: 1, 128>}, {pipeline_mode = #tpu.pipeline_mode<synchronous>, transform_indices = @transform_7, window_bounds = array<i64: 128, 128>}, {pipeline_mode = #tpu.pipeline_mode<synchronous>, transform_indices = @transform_8, window_bounds = array<i64: 1, 128>}, {pipeline_mode = #tpu.pipeline_mode<synchronous>, transform_indices = @transform_9, window_bounds = array<i64: 128, 128>}, {pipeline_mode = #tpu.pipeline_mode<synchronous>, transform_indices = @transform_10, window_bounds = array<i64: 1, 128>}, {transform_indices = @transform_11, window_bounds = array<i64: 32, 128>}]} {
    %c0 = arith.constant 0 : index
    %c0_0 = arith.constant 0 : index
    %0 = vector.load %arg1[%c0, %c0_0] : memref<32x20xf32, #tpu.memory_space<vmem>>, vector<32x20xf32>
    %1 = arith.truncf %0 : vector<32x20xf32> to vector<32x20xbf16>
    %c0_1 = arith.constant 0 : index
    %c0_2 = arith.constant 0 : index
    %2 = vector.load %arg2[%c0_1, %c0_2] : memref<32x12xf32, #tpu.memory_space<vmem>>, vector<32x12xf32>
    %3 = arith.truncf %2 : vector<32x12xf32> to vector<32x12xbf16>
    %c0_3 = arith.constant 0 : index
    %c0_4 = arith.constant 0 : index
    %4 = vector.load %arg3[%c0_3, %c0_4] : memref<20x128xbf16, #tpu.memory_space<vmem>>, vector<20x128xbf16>
    %cst = arith.constant dense<0.000000e+00> : vector<32x128xf32>
    %5 = tpu.matmul %1, %4, %cst {dimension_numbers = #tpu.dot_dimension_numbers<[1], [0], [0], [1], [0, 0, 1, 1], [], []>} : vector<32x20xbf16>, vector<20x128xbf16>, vector<32x128xf32> -> vector<32x128xf32>
    %c0_5 = arith.constant 0 : index
    %c0_6 = arith.constant 0 : index
    %6 = vector.load %arg4[%c0_5, %c0_6] : memref<12x128xbf16, #tpu.memory_space<vmem>>, vector<12x128xbf16>
    %cst_7 = arith.constant dense<0.000000e+00> : vector<32x128xf32>
    %7 = tpu.matmul %3, %6, %cst_7 {dimension_numbers = #tpu.dot_dimension_numbers<[1], [0], [0], [1], [0, 0, 1, 1], [], []>} : vector<32x12xbf16>, vector<12x128xbf16>, vector<32x128xf32> -> vector<32x128xf32>
    %8 = arith.addf %5, %7 : vector<32x128xf32>
    %c0_8 = arith.constant 0 : index
    %c0_9 = arith.constant 0 : index
    %9 = vector.load %arg5[%c0_8, %c0_9] : memref<1x128xf32, #tpu.memory_space<vmem>>, vector<1x128xf32>
    %10 = vector.broadcast %9 : vector<1x128xf32> to vector<32x128xf32>
    %11 = arith.addf %8, %10 : vector<32x128xf32>
    %12 = arith.truncf %11 : vector<32x128xf32> to vector<32x128xbf16>
    %cst_10 = arith.constant 0.000000e+00 : bf16
    %13 = vector.broadcast %cst_10 : bf16 to vector<32x128xbf16>
    %14 = arith.maximumf %12, %13 : vector<32x128xbf16>
    %c0_11 = arith.constant 0 : index
    %c0_12 = arith.constant 0 : index
    %15 = vector.load %arg6[%c0_11, %c0_12] : memref<128x128xbf16, #tpu.memory_space<vmem>>, vector<128x128xbf16>
    %cst_13 = arith.constant dense<0.000000e+00> : vector<32x128xf32>
    %16 = tpu.matmul %14, %15, %cst_13 {dimension_numbers = #tpu.dot_dimension_numbers<[1], [0], [0], [1], [0, 0, 1, 1], [], []>} : vector<32x128xbf16>, vector<128x128xbf16>, vector<32x128xf32> -> vector<32x128xf32>
    %c0_14 = arith.constant 0 : index
    %c0_15 = arith.constant 0 : index
    %17 = vector.load %arg7[%c0_14, %c0_15] : memref<1x128xf32, #tpu.memory_space<vmem>>, vector<1x128xf32>
    %18 = vector.broadcast %17 : vector<1x128xf32> to vector<32x128xf32>
    %19 = arith.addf %16, %18 : vector<32x128xf32>
    %20 = arith.truncf %19 : vector<32x128xf32> to vector<32x128xbf16>
    %cst_16 = arith.constant 0.000000e+00 : bf16
    %21 = vector.broadcast %cst_16 : bf16 to vector<32x128xbf16>
    %22 = arith.maximumf %20, %21 : vector<32x128xbf16>
    %c0_17 = arith.constant 0 : index
    %c0_18 = arith.constant 0 : index
    %23 = vector.load %arg8[%c0_17, %c0_18] : memref<128x128xbf16, #tpu.memory_space<vmem>>, vector<128x128xbf16>
    %cst_19 = arith.constant dense<0.000000e+00> : vector<32x128xf32>
    %24 = tpu.matmul %22, %23, %cst_19 {dimension_numbers = #tpu.dot_dimension_numbers<[1], [0], [0], [1], [0, 0, 1, 1], [], []>} : vector<32x128xbf16>, vector<128x128xbf16>, vector<32x128xf32> -> vector<32x128xf32>
    %c0_20 = arith.constant 0 : index
    %c0_21 = arith.constant 0 : index
    %25 = vector.load %arg9[%c0_20, %c0_21] : memref<1x128xf32, #tpu.memory_space<vmem>>, vector<1x128xf32>
    %26 = vector.broadcast %25 : vector<1x128xf32> to vector<32x128xf32>
    %27 = arith.addf %24, %26 : vector<32x128xf32>
    %28 = arith.truncf %27 : vector<32x128xf32> to vector<32x128xbf16>
    %cst_22 = arith.constant 0.000000e+00 : bf16
    %29 = vector.broadcast %cst_22 : bf16 to vector<32x128xbf16>
    %30 = arith.maximumf %28, %29 : vector<32x128xbf16>
    %c0_23 = arith.constant 0 : index
    %c0_24 = arith.constant 0 : index
    %31 = vector.load %arg10[%c0_23, %c0_24] : memref<128x128xbf16, #tpu.memory_space<vmem>>, vector<128x128xbf16>
    %cst_25 = arith.constant dense<0.000000e+00> : vector<32x128xf32>
    %32 = tpu.matmul %30, %31, %cst_25 {dimension_numbers = #tpu.dot_dimension_numbers<[1], [0], [0], [1], [0, 0, 1, 1], [], []>} : vector<32x128xbf16>, vector<128x128xbf16>, vector<32x128xf32> -> vector<32x128xf32>
    %c0_26 = arith.constant 0 : index
    %c0_27 = arith.constant 0 : index
    %33 = vector.load %arg11[%c0_26, %c0_27] : memref<1x128xf32, #tpu.memory_space<vmem>>, vector<1x128xf32>
    %34 = vector.broadcast %33 : vector<1x128xf32> to vector<32x128xf32>
    %35 = arith.addf %32, %34 : vector<32x128xf32>
    %36 = arith.truncf %35 : vector<32x128xf32> to vector<32x128xbf16>
    %c0_28 = arith.constant 0 : index
    %c0_29 = arith.constant 0 : index
    %37 = vector.load %arg12[%c0_28, %c0_29] : memref<32x128xbf16, #tpu.memory_space<vmem>>, vector<32x128xbf16>
    tpu.vector_store %arg12[%c0_28, %c0_29], %36 {strides = array<i32>} : memref<32x128xbf16, #tpu.memory_space<vmem>>, vector<32x128xbf16>,
    return
  }
  func.func @transform_0(%arg0: i32) -> (i32, i32) {
    %c0_i32 = arith.constant 0 : i32
    %c0_i32_0 = arith.constant 0 : i32
    return %arg0, %c0_i32 : i32, i32
  }
  func.func @transform_1(%arg0: i32) -> (i32, i32) {
    %c0_i32 = arith.constant 0 : i32
    %c0_i32_0 = arith.constant 0 : i32
    return %arg0, %c0_i32 : i32, i32
  }
  func.func @transform_2(%arg0: i32) -> (i32, i32) {
    %c0_i32 = arith.constant 0 : i32
    %c0_i32_0 = arith.constant 0 : i32
    %c0_i32_1 = arith.constant 0 : i32
    return %c0_i32, %c0_i32_0 : i32, i32
  }
  func.func @transform_3(%arg0: i32) -> (i32, i32) {
    %c0_i32 = arith.constant 0 : i32
    %c0_i32_0 = arith.constant 0 : i32
    %c0_i32_1 = arith.constant 0 : i32
    return %c0_i32, %c0_i32_0 : i32, i32
  }
  func.func @transform_4(%arg0: i32) -> (i32, i32) {
    %c0_i32 = arith.constant 0 : i32
    %c0_i32_0 = arith.constant 0 : i32
    %c0_i32_1 = arith.constant 0 : i32
    return %c0_i32, %c0_i32_0 : i32, i32
  }
  func.func @transform_5(%arg0: i32) -> (i32, i32) {
    %c0_i32 = arith.constant 0 : i32
    %c0_i32_0 = arith.constant 0 : i32
    %c0_i32_1 = arith.constant 0 : i32
    return %c0_i32, %c0_i32_0 : i32, i32
  }
  func.func @transform_6(%arg0: i32) -> (i32, i32) {
    %c0_i32 = arith.constant 0 : i32
    %c0_i32_0 = arith.constant 0 : i32
    %c0_i32_1 = arith.constant 0 : i32
    return %c0_i32, %c0_i32_0 : i32, i32
  }
  func.func @transform_7(%arg0: i32) -> (i32, i32) {
    %c0_i32 = arith.constant 0 : i32
    %c0_i32_0 = arith.constant 0 : i32
    %c0_i32_1 = arith.constant 0 : i32
    return %c0_i32, %c0_i32_0 : i32, i32
  }
  func.func @transform_8(%arg0: i32) -> (i32, i32) {
    %c0_i32 = arith.constant 0 : i32
    %c0_i32_0 = arith.constant 0 : i32
    %c0_i32_1 = arith.constant 0 : i32
    return %c0_i32, %c0_i32_0 : i32, i32
  }
  func.func @transform_9(%arg0: i32) -> (i32, i32) {
    %c0_i32 = arith.constant 0 : i32
    %c0_i32_0 = arith.constant 0 : i32
    %c0_i32_1 = arith.constant 0 : i32
    return %c0_i32, %c0_i32_0 : i32, i32
  }
  func.func @transform_10(%arg0: i32) -> (i32, i32) {
    %c0_i32 = arith.constant 0 : i32
    %c0_i32_0 = arith.constant 0 : i32
    %c0_i32_1 = arith.constant 0 : i32
    return %c0_i32, %c0_i32_0 : i32, i32
  }
  func.func @transform_11(%arg0: i32) -> (i32, i32) {
    %c0_i32 = arith.constant 0 : i32
    %c0_i32_0 = arith.constant 0 : i32
    return %arg0, %c0_i32 : i32, i32
  }
}

</mosaic_0001>

<bundles_post_ra>
// kernel: tpu_custom_call.1
= control target key start
LH: loop header
LB: loop body
LE: loop exit
PB: predicated region body
PF: predicated region fallthrough
CT: control target
= control target key end

     0   :  { %16 = vsyncpa [#allocation3], 0  ;;  %s1926_s0 = inlined_call_operand.vmem [shape: f32[40,20], index: 0, kind: input, shape index: {}]   ;;  %s1927_s1 = inlined_call_operand.vmem [shape: f32[40,12], index: 1, kind: input, shape index: {}]   ;;  %s1928_s2 = inlined_call_operand.hbm [shape: bf16[20,128], index: 2, kind: input, shape index: {}]   ;;  %s1929_s3 = inlined_call_operand.hbm [shape: bf16[12,128], index: 3, kind: input, shape index: {}]   ;;  %s1930_s4 = inlined_call_operand.vmem [shape: f32[1,128], index: 4, kind: input, shape index: {}]   ;;  %s1931_s5 = inlined_call_operand.vmem [shape: bf16[128,128], index: 5, kind: input, shape index: {}]   ;;  %s1932_s6 = inlined_call_operand.vmem [shape: f32[1,128], index: 6, kind: input, shape index: {}]   ;;  %s1933_s7 = inlined_call_operand.vmem [shape: bf16[128,128], index: 7, kind: input, shape index: {}]   ;;  %s1934_s8 = inlined_call_operand.vmem [shape: f32[1,128], index: 8, kind: input, shape index: {}]   ;;  %s1935_s9 = inlined_call_operand.hbm [shape: bf16[128,128], index: 9, kind: input, shape index: {}]   ;;  %s1936_s10 = inlined_call_operand.vmem [shape: f32[1,128], index: 10, kind: input, shape index: {}]   ;;  %s1937_s11 = inlined_call_operand.hbm [shape: bf16[40,128], index: 11, kind: output, shape index: {}]  }
   0x1   :  { %17 = vsyncpa [#allocation6], 0 }
   0x2   :  { %18 = vsyncpa [#allocation4], 0 }
   0x3   :  { %20 = vsyncpa [#allocation4 + $0x1], 0  ;;  %s1688_s17 = smov 0   ;;  %s1690_s18 = smov 0  }
   0x4   :  { %s1692_s19 = smov 0   ;;  %s1694_s20 = smov 0  }
   0x5 LB: > { %1940 = sst [smem:[#allocation12_spill]] %s1613_s19  ;;  %s1709_s21 = sadd.s32 4294967295, %s1617_s20   ;;  %s1617_s20 = sphi %s1694_s20, %s1956_s20   ;;  %s1613_s19 = sphi %s1692_s19, %s1953_s19   ;;  %s1609_s18 = sphi %s1690_s18, %s1955_s18   ;;  %s1605_s17 = sphi %s1688_s17, %s1954_s17  }
   0x6   : > { %s1178_s22 = sadd.s32 4294967294, %s1617_s20   ;;  %s1713_s23 = sadd.s32 1, %s1617_s20  }
   0x7   : > { %s274_s24 = sadd.s32 1, %s1613_s19  ;;  %s271_s25 = ssub.s32 %s1617_s20, %s1713_s23 }
   0x8   : > { %p284_p0 = scmp.ne.s32.totalorder %s1613_s19, %s1609_s18  ;;  %p272_p1 = scmp.eq.s32.totalorder %s271_s25, 0 }
   0x9   : > { %p285_p2 = scmp.eq.s32.totalorder %s1709_s21, 1  ;;  %p290_p3 = scmp.ne.s32.totalorder %s1609_s18, %s1605_s17 }
   0xa   : > { %p291_p4 = scmp.eq.s32.totalorder %s1178_s22, 1  ;;  %p1179_p7 = scmp.ge.s32.totalorder %s1617_s20, 1 }
   0xb   : > { %s1724_s26 = scalar_select %p272_p1, %s1613_s19, %s274_s24  }
   0xc   : > { %p1726_p5 = por %p285_p2, %p284_p0  ;;  %p1730_p6 = por %p291_p4, %p290_p3 }
   0xd   : > { %1941 = sst [smem:[#allocation13_spill]] %s1724_s26  ;;  %p298_p8 = scmp.lt.s32.totalorder %s1617_s20, 3 }
   0xe   : > { %s1942_s27 = scalar_select %p1726_p5, 1, 0 }
   0xf   : > { %s1943_s28 = scalar_select %p1730_p6, 1, 0 }
  0x10   : > { %p1938_p9 = scmp.eq.s32.totalorder %s1709_s21, 0  ;;  %p1737_p10 = pnand %p1179_p7, %p298_p8 }
  0x11   : > { %s1619_s30 = smov [#allocation5]   ;;  %s1620_s14 = smov [#allocation2]  }
  0x12   : > { %p1383_p11 = pneg %p1737_p10  ;;  %s323_s12 = sshll.u32 %s1619_s30, 4  ;;  %s324_s12 = int_to_ptr.vmem [resolvable:$true] %s323_s12 }
  0x13   : > { %s310_s15 = sshll.u32 %s1620_s14, 4  ;;  %s1621_s16 = smov [#allocation7]   ;;  %s311_s15 = int_to_ptr.vmem [resolvable:$true] %s310_s15 }
  0x14   : > { %p1745_p12 = pnand %p1938_p9, %p1383_p11  ;;  %s351_s22 = sshll.u32 %s1621_s16, 4  ;;  %s352_s22 = int_to_ptr.vmem [resolvable:$true] %s351_s22 }
  0x15   : > { %s1482_s24 = scalar_lea.vmem %s324_s12, 128  ;;  %p1490_p3 = scmp.lt.s32.totalorder %s324_s12, %s324_s12 }
  0x16   : > { %p1473_p13 = pneg %p1745_p12  ;;  %p1483_p0 = scmp.ne.s32.totalorder %s324_s12, %s1482_s24 }
  0x17   : > { %p1491_p4 = scmp.lt.s32.totalorder %s1482_s24, %s1482_s24 }
  0x18   : > { %p1485_p1 = pnand %p1483_p0, %p1473_p13 }
  0x19   : > { %p1492_p7 = por %p1491_p4, %p1490_p3 }
  0x1a   : > { %p1486_p2 = pneg %p1485_p1 }
  0x1c   : > { %p1493_p8 = pnand %p1492_p7, %p1486_p2 }
  0x1e   : > { %1496 = shalt.err (!%p1493_p8)
}
  0x1f   : > { %s1622_s25 = smov 64   ;;  %s1623_s30 = smov 4  }
  0x20   : > { %1389 = dma.hbm_to_vmem [thread:$0]  (!%p1745_p12), %s1929_s3, 128, %s324_s12, [#allocation6], %s1622_s25, %s1622_s25, %s1623_s30  }
  0x21   : > { %s1508_s26 = scalar_lea.vmem %s311_s15, 192  ;;  %p1516_p9 = scmp.lt.s32.totalorder %s311_s15, %s311_s15 }
  0x22   : > { %p1509_p11 = scmp.ne.s32.totalorder %s311_s15, %s1508_s26  ;;  %p1517_p6 = scmp.lt.s32.totalorder %s1508_s26, %s1508_s26 }
  0x24   : > { %p1511_p0 = pnand %p1509_p11, %p1473_p13  ;;  %p1518_p3 = por %p1517_p6, %p1516_p9 }
  0x26   : > { %p1512_p1 = pneg %p1511_p0 }
  0x28   : > { %p1519_p2 = pnand %p1518_p3, %p1512_p1 }
  0x2a   : > { %1522 = shalt.err (!%p1519_p2)
}
  0x2b   : > { %1386 = dma.hbm_to_vmem [thread:$0]  (!%p1745_p12), %s1928_s2, 192, %s311_s15, [#allocation3], %s1622_s25, %s1622_s25, %s1623_s30  }
  0x2c   : > { %s1534_s12 = scalar_lea.vmem %s352_s22, 1024  ;;  %p1542_p11 = scmp.lt.s32.totalorder %s352_s22, %s352_s22 }
  0x2d   : > { %p1535_p4 = scmp.ne.s32.totalorder %s352_s22, %s1534_s12  ;;  %p1543_p0 = scmp.lt.s32.totalorder %s1534_s12, %s1534_s12 }
  0x2f   : > { %p1537_p7 = pnand %p1535_p4, %p1473_p13  ;;  %p1544_p5 = por %p1543_p0, %p1542_p11 }
  0x31   : > { %p1538_p8 = pneg %p1537_p7 }
  0x33   : > { %p1545_p6 = pnand %p1544_p5, %p1538_p8 }
  0x35   : > { %1548 = shalt.err (!%p1545_p6)
}
  0x36   : > { %1392 = dma.hbm_to_vmem [thread:$0]  (!%p1745_p12), %s1935_s9, 1024, %s352_s22, [#allocation6], %s1622_s25, %s1622_s25, %s1623_s30  }
  0x37   : > { %404 = sbr.rel (%p1737_p10) target bundleno = 934 (0x3a6), region = 64  ;;  %p1946_p9 = scmp.eq.s32.totalorder (!%p1737_p10), %s1709_s21, 0 }
  0x3c   : > { %1592 = dma.done.wait (%p1946_p9), [#allocation3], 192   ;;  %p1947_p13 = pmov %p1946_p9 }
  0x3d   : > { %p1948_p1 = pmov %p1946_p9 }
  0x3e   : > { %1594 = vsyncadd (%p1947_p13), [#allocation3], 4294967104 }
  0x3f   : > { %1596 = dma.done.wait (%p1948_p1), [#allocation6], 1152   ;;  %p1949_p5 = pmov %p1948_p1 }
  0x40   : > { %s1786_s19 = sshll.u32 %s1709_s21, 2  ;;  %vm528_vm0 = vcmask 1045504   ;;  %v1444_v0 = vld [vmem:[#allocation5] sm:$0x3f]   ;;  %vm521_vm1 = vcmask 97280   ;;  %vm597_vm2 = vcmask 1041408  }
  0x41   : > { %1598 = vsyncadd (%p1949_p5), [#allocation6], 4294966144  ;;  %p470_p12 = scmp.lt.s32.totalorder %s1786_s19, 4  ;;  %1368 = vmatprep.subr.msk.bf16.mxu1 %vm528_vm0, %v1444_v0  ;;  %v530_v2 = vsel %vm528_vm0, %v1444_v0, 0  ;;  %v1446_v9 = vld [vmem:[#allocation2] sm:$0xff]   ;;  %vm590_vm3 = vcmask 162816  }
  0x42   : > { %1295 = vmatpush3.bf16.msra.mxu1 %v530_v2  ;;  %v1445_v8 = vld [vmem:[#allocation2 + $0x8] ss:$0 sps:$4 sm:$0x33]   ;;  %v1447_v16 = vld [vmem:[%s1931_s5 + $0x38] sm:$0xff]   ;;  %v1448_v17 = vld [vmem:[%s1931_s5 + $0x30] sm:$0xff]   ;;  %v1624_v49 = vmov 0  }
  0x43   : > { %s471_s29 = scalar_select %p470_p12, %s1786_s19, 4  ;;  %1369 = vmatprep.subr.msk.bf16.mxu1 %vm597_vm2, %v1445_v8  ;;  %v599_v13 = vsel %vm597_vm2, %v1445_v8, 0  ;;  %1308 = vmatprep.subr.bf16.mxu0 %v1447_v16  ;;  %v1449_v19 = vld [vmem:[%s1931_s5 + $0x28] sm:$0xff]   ;;  %v1450_v20 = vld [vmem:[%s1931_s5 + $0x20] sm:$0xff]   ;;  %v1451_v21 = vld [vmem:[%s1931_s5 + $0x18] sm:$0xff]  }
  0x44   : > { %1309 = vmatpush3.bf16.msra.mxu0 %v1447_v16  ;;  %v1452_v22 = vld [vmem:[%s1931_s5 + $0x10] sm:$0xff]   ;;  %v1453_v23 = vld [vmem:[%s1931_s5 + $0x8] sm:$0xff]   ;;  %v1454_v24 = vld [vmem:[%s1931_s5] sm:$0xff]   ;;  %s462_s15 = sand.u32 1, %s1609_s18   ;;  %p1950_p10 = scmp.ne.s32.totalorder %s1942_s27, 0 }
  0x45   : > { %s1190_s13 = sshll.u32 %s471_s29, 3  ;;  %1310 = vmatprep.subr.bf16.mxu0 %v1448_v17  ;;  %v1455_v25 = vld [vmem:[%s1933_s7 + $0x38] sm:$0xff]   ;;  %v1456_v26 = vld [vmem:[%s1933_s7 + $0x30] sm:$0xff]   ;;  %v1457_v27 = vld [vmem:[%s1933_s7 + $0x28] sm:$0xff]   ;;  %s1188_s30 = sshll.u32 %s462_s15, 4 }
  0x46   : > { %s487_s25 = scalar_lea.vmem %s1927_s1, %s1190_s13  ;;  %s473_s24 = scalar_lea.vmem %s1926_s0, %s1190_s13  ;;  %v1458_v28 = vld [vmem:[%s1933_s7 + $0x20] sm:$0xff]   ;;  %v1459_v29 = vld [vmem:[%s1933_s7 + $0x18] sm:$0xff]   ;;  %v1460_v52 = vld [vmem:[%s1933_s7 + $0x10] sm:$0xff]  }
  0x47   : > { %v505_v1 = vld [vmem:[%s487_s25] sm:$0xff]  ;;  %v506_v3 = vld [vmem:[%s487_s25 + $0x8] sm:$0xff]  ;;  %v507_v4 = vld [vmem:[%s487_s25 + $0x10] sm:$0xff]  ;;  %s464_s16 = scalar_lea.vmem [#allocation8], %s1188_s30  ;;  %s1062_s12 = ssub.s32 (%p1950_p10), 5, %s1786_s19 }
  0x48   : > { %v508_v5 = vld [vmem:[%s487_s25 + $0x18] sm:$0xff]  ;;  %v509_v6 = vpack.c.bf16 %v506_v3, %v505_v1  ;;  %v499_v10 = vld [vmem:[%s473_s24] sm:$0xff]  ;;  %v501_v11 = vld [vmem:[%s473_s24 + $0x10] sm:$0xff]  ;;  %1311 = vmatpush3.bf16.msra.mxu0 %v1448_v17  ;;  %p1063_p3 = scmp.lt.s32.totalorder (%p1950_p10), %s1062_s12, 4 }
  0x49   : > { %v510_v7 = vpack.c.bf16 %v508_v5, %v507_v4  ;;  %v502_v12 = vld [vmem:[%s473_s24 + $0x18] sm:$0xff]  ;;  %v500_v14 = vld [vmem:[%s473_s24 + $0x8] sm:$0xff]  ;;  %1312 = vmatprep.subr.bf16.mxu0 %v1449_v19  ;;  %v1200_v38 = vld [vmem:[%s1930_s4] ss:$0 sm:$0xff]  ;;  %s1867_s24 = scalar_lea.sflag [#allocation4], %s462_s15 }
  0x4a   : > { %1296 = vmatprep.mubr.msk.bf16.mxu1 %vm521_vm1, %v509_v6  ;;  %v503_v15 = vpack.c.bf16 %v500_v14, %v499_v10  ;;  %v504_v18 = vpack.c.bf16 %v502_v12, %v501_v11  ;;  %v1461_v53 = vld [vmem:[%s1933_s7 + $0x8] sm:$0xff]   ;;  %v1462_v54 = vld [vmem:[%s1933_s7] sm:$0xff]   ;;  %v1466_v58 = vld [vmem:[#allocation7 + $0x20] sm:$0xff]  }
  0x4b   : > { %1297 = vmatmul.mubr.msk.bf16.vlgmr.msra.gmra.mxu1 %vm521_vm1, %v510_v7  ;;  %v1463_v55 = vld [vmem:[#allocation7 + $0x38] sm:$0xff]   ;;  %v1464_v56 = vld [vmem:[#allocation7 + $0x30] sm:$0xff]   ;;  %v1465_v57 = vld [vmem:[#allocation7 + $0x28] sm:$0xff]  }
  0x4c   : > { %1301 = vmatpush3.bf16.msra.mxu1 %v599_v13  ;;  %1304 = vmatprep.mubr.msk.bf16.mxu1 %vm590_vm3, %v503_v15  ;;  %v1467_v59 = vld [vmem:[#allocation7 + $0x18] sm:$0xff]   ;;  %v1201_v62 = vld [vmem:[%s1932_s6] ss:$0 sm:$0xff]  ;;  %v1470_v11 = vld [vmem:[#allocation7] sm:$0xff]  }
  0x4d   : > { %1302 = vmatprep.subr.bf16.mxu1 %v1446_v9  ;;  %1313 = vmatpush3.bf16.msra.mxu0 %v1449_v19  ;;  %v1469_v10 = vld [vmem:[#allocation7 + $0x8] sm:$0xff]  }
  0x4e   : > { %1314 = vmatprep.subr.bf16.mxu0 %v1450_v20  ;;  %v1210_v14 = vld [vmem:[%s1934_s8] ss:$0 sm:$0xff] }
  0x50   : > { %1303 = vmatpush3.bf16.msra.mxu1 %v1446_v9  ;;  %v1468_v9 = vld [vmem:[#allocation7 + $0x10] sm:$0xff]  }
  0x51   : > { %1315 = vmatpush3.bf16.msra.mxu0 %v1450_v20  ;;  %1328 = vmatprep.subr.bf16.mxu1 %v1455_v25 }
  0x52   : > { %1316 = vmatprep.subr.bf16.mxu0 %v1451_v21 }
  0x53   : > { %1305 = vmatmul.mubr.msk.bf16.vlgmr.msra.gmra.mxu1 %vm590_vm3, %v504_v18 }
  0x54   : > { %1329 = vmatpush3.bf16.msra.mxu1 %v1455_v25 }
  0x55   : > { %1317 = vmatpush3.bf16.msra.mxu0 %v1451_v21  ;;  %1330 = vmatprep.subr.bf16.mxu1 %v1456_v26 }
  0x56   : > { %1318 = vmatprep.subr.bf16.mxu0 %v1452_v22 }
  0x58   : > { %1331 = vmatpush3.bf16.msra.mxu1 %v1456_v26  ;;  %v1219_v26 = vld [vmem:[%s1936_s10] ss:$0 sm:$0xff] }
  0x59   : > { %1319 = vmatpush3.bf16.msra.mxu0 %v1452_v22  ;;  %1332 = vmatprep.subr.bf16.mxu1 %v1457_v27 }
  0x5a   : > { %1320 = vmatprep.subr.bf16.mxu0 %v1453_v23 }
  0x5c   : > { %1333 = vmatpush3.bf16.msra.mxu1 %v1457_v27 }
  0x5d   : > { %1321 = vmatpush3.bf16.msra.mxu0 %v1453_v23  ;;  %1334 = vmatprep.subr.bf16.mxu1 %v1458_v28 }
  0x5e   : > { %1322 = vmatprep.subr.bf16.mxu0 %v1454_v24 }
  0x60   : > { %1335 = vmatpush3.bf16.msra.mxu1 %v1458_v28 }
  0x61   : > { %1323 = vmatpush3.bf16.msra.mxu0 %v1454_v24  ;;  %1336 = vmatprep.subr.bf16.mxu1 %v1459_v29 }
  0x62   : > { %1348 = vmatprep.subr.bf16.mxu0 %v1463_v55 }
  0x64   : > { %1337 = vmatpush3.bf16.msra.mxu1 %v1459_v29 }
  0x65   : > { %1338 = vmatprep.subr.bf16.mxu1 %v1460_v52 }
  0x68   : > { %1339 = vmatpush3.bf16.msra.mxu1 %v1460_v52 }
  0x69   : > { %1340 = vmatprep.subr.bf16.mxu1 %v1461_v53 }
  0x6c   : > { %1341 = vmatpush3.bf16.msra.mxu1 %v1461_v53 }
  0x6d   : > { %1342 = vmatprep.subr.bf16.mxu1 %v1462_v54 }
  0x70   : > { %1343 = vmatpush3.bf16.msra.mxu1 %v1462_v54 }
 0x10b   : > { %v1298_v30 = vpop.f32.mrf.mxu1 }
 0x10d   : > { %v566_v31 = vpop.f32.mrf.mxu1 }
 0x10f   : > { %v1299_v32 = vpop.f32.mrf.mxu1 }
 0x111   : > { %v569_v33 = vpop.f32.mrf.mxu1 }
 0x113   : > { %v1306_v34 = vpop.f32.mrf.mxu1 }
 0x114   : > { %v644_v36 = vadd.f32 %v1306_v34, %v1298_v30 }
 0x115   : > { %v635_v35 = vpop.f32.mrf.mxu1 }
 0x116   : > { %v636_v39 = vadd.f32 %v635_v35, %v566_v31  ;;  %v659_v44 = vadd.f32 %v1200_v38, %v644_v36 }
 0x117   : > { %v1307_v37 = vpop.f32.mrf.mxu1 }
 0x118   : > { %v647_v40 = vadd.f32 %v1307_v37, %v1299_v32  ;;  %v657_v45 = vadd.f32 %v1200_v38, %v636_v39 }
 0x119   : > { %v638_v41 = vpop.f32.mrf.mxu1 }
 0x11a   : > { %v660_v42 = vadd.f32 %v1200_v38, %v647_v40  ;;  %v639_v43 = vadd.f32 %v638_v41, %v569_v33 }
 0x11c   : > { %v658_v46 = vadd.f32 %v1200_v38, %v639_v43  ;;  %v662_v47 = vpack.c.bf16 %v660_v42, %v659_v44 }
 0x11e   : > { %v661_v48 = vpack.c.bf16 %v658_v46, %v657_v45  ;;  %v664_v51 = vmax.bf16 %v1624_v49, %v662_v47 }
 0x120   : > { %v663_v50 = vmax.bf16 %v1624_v49, %v661_v48 }
 0x122   : > { %1324 = vmatprep.mubr.bf16.mxu0 %v663_v50 }
 0x123   : > { %1325 = vmatmul.mubr.bf16.vlgmr.msra.gmra.mxu0 %v664_v51 }
 0x124   : > { %1349 = vmatpush3.bf16.msra.mxu0 %v1463_v55 }
 0x125   : > { %1350 = vmatprep.subr.bf16.mxu0 %v1464_v56 }
 0x128   : > { %1351 = vmatpush3.bf16.msra.mxu0 %v1464_v56 }
 0x129   : > { %1352 = vmatprep.subr.bf16.mxu0 %v1465_v57 }
 0x12c   : > { %1353 = vmatpush3.bf16.msra.mxu0 %v1465_v57 }
 0x12d   : > { %1354 = vmatprep.subr.bf16.mxu0 %v1466_v58 }
 0x130   : > { %1355 = vmatpush3.bf16.msra.mxu0 %v1466_v58 }
 0x131   : > { %1356 = vmatprep.subr.bf16.mxu0 %v1467_v59 }
 0x134   : > { %1357 = vmatpush3.bf16.msra.mxu0 %v1467_v59 }
 0x135   : > { %1358 = vmatprep.subr.bf16.mxu0 %v1468_v9 }
 0x138   : > { %1359 = vmatpush3.bf16.msra.mxu0 %v1468_v9 }
 0x139   : > { %1360 = vmatprep.subr.bf16.mxu0 %v1469_v10 }
 0x13c   : > { %1361 = vmatpush3.bf16.msra.mxu0 %v1469_v10 }
 0x13d   : > { %1362 = vmatprep.subr.bf16.mxu0 %v1470_v11 }
 0x140   : > { %1363 = vmatpush3.bf16.msra.mxu0 %v1470_v11 }
 0x1e3   : > { %v1326_v60 = vpop.f32.mrf.mxu0 }
 0x1e4   : > { %v779_v1 = vadd.f32 %v1326_v60, %v1201_v62 }
 0x1e5   : > { %v770_v61 = vpop.f32.mrf.mxu0 }
 0x1e6   : > { %v771_v3 = vadd.f32 %v1201_v62, %v770_v61 }
 0x1e7   : > { %v1327_v63 = vpop.f32.mrf.mxu0 }
 0x1e8   : > { %v782_v0 = vadd.f32 %v1327_v63, %v1201_v62 }
 0x1e9   : > { %v773_v2 = vpop.f32.mrf.mxu0 }
 0x1ea   : > { %v774_v4 = vadd.f32 %v1201_v62, %v773_v2  ;;  %v786_v5 = vpack.c.bf16 %v782_v0, %v779_v1 }
 0x1ec   : > { %v785_v6 = vpack.c.bf16 %v774_v4, %v771_v3  ;;  %v788_v8 = vmax.bf16 %v1624_v49, %v786_v5 }
 0x1ee   : > { %v787_v7 = vmax.bf16 %v1624_v49, %v785_v6 }
 0x1f0   : > { %1344 = vmatprep.mubr.bf16.mxu1 %v787_v7 }
 0x1f1   : > { %1345 = vmatmul.mubr.bf16.vlgmr.msra.gmra.mxu1 %v788_v8 }
 0x2b1   : > { %v1346_v12 = vpop.f32.mrf.mxu1 }
 0x2b2   : > { %v903_v17 = vadd.f32 %v1346_v12, %v1210_v14 }
 0x2b3   : > { %v894_v13 = vpop.f32.mrf.mxu1 }
 0x2b4   : > { %v895_v19 = vadd.f32 %v1210_v14, %v894_v13 }
 0x2b5   : > { %v1347_v15 = vpop.f32.mrf.mxu1 }
 0x2b6   : > { %v906_v16 = vadd.f32 %v1347_v15, %v1210_v14 }
 0x2b7   : > { %v897_v18 = vpop.f32.mrf.mxu1 }
 0x2b8   : > { %v898_v20 = vadd.f32 %v1210_v14, %v897_v18  ;;  %v910_v21 = vpack.c.bf16 %v906_v16, %v903_v17 }
 0x2ba   : > { %v909_v22 = vpack.c.bf16 %v898_v20, %v895_v19  ;;  %v912_v24 = vmax.bf16 %v1624_v49, %v910_v21 }
 0x2bc   : > { %v911_v23 = vmax.bf16 %v1624_v49, %v909_v22 }
 0x2be   : > { %1364 = vmatprep.mubr.bf16.mxu0 %v911_v23 }
 0x2bf   : > { %1365 = vmatmul.mubr.bf16.vlgmr.msra.gmra.mxu0 %v912_v24 }
 0x37f   : > { %v1366_v25 = vpop.f32.mrf.mxu0 }
 0x380   : > { %v1027_v29 = vadd.f32 %v1366_v25, %v1219_v26 }
 0x381   : > { %v1018_v27 = vpop.f32.mrf.mxu0 }
 0x382   : > { %v1019_v32 = vadd.f32 %v1219_v26, %v1018_v27 }
 0x383   : > { %v1367_v28 = vpop.f32.mrf.mxu0 }
 0x384   : > { %v1030_v30 = vadd.f32 %v1367_v28, %v1219_v26 }
 0x385   : > { %v1021_v31 = vpop.f32.mrf.mxu0 }
 0x386   : > { %v1254_v33 = vpack.c.bf16 %v1030_v30, %v1027_v29  ;;  %v1022_v34 = vadd.f32 %v1219_v26, %v1021_v31  ;;  %1060 = sbr.rel (!%p1950_p10) target bundleno = 934 (0x3a6), region = 80 }
 0x388   : > { %1256 = vst [vmem:[%s464_s16 + $0x8] sm:$0xff] %v1254_v33   ;;  %v1249_v35 = vpack.c.bf16 %v1022_v34, %v1019_v32 }
 0x38a   : > { %1250 = vst [vmem:[%s464_s16] sm:$0xff] %v1249_v35  }
 0x38b   : > { %s1958_s12 = smov (!%p1063_p3, %s1062_s12), 4 }
 0x38c   : > { %s1872_s26 = sshll.u32 %s1958_s12, 6 }
 0x38d   : > { %s1067_s14 = ssub.s32 256, %s1872_s26 }
 0x38e   : > { %1068 = vsyncadd %s1867_s24, %s1067_s14  ;;  %p1235_p2 = scmp.ne.s32.totalorder %s1872_s26, 0  ;;  %s1245_s29 = sshll.u32 %s1709_s21, 8 }
 0x38f   : > { %s1881_s27 = scalar_lea.hbm %s1937_s11, %s1245_s29  ;;  %s1073_s22 = sshll.u32 %s464_s16, 4  ;;  %s1883_s22 = int_to_ptr.vmem [resolvable:$true] %s1073_s22 }
 0x390   : > { %s1549_s19 = scalar_lea.vmem %s1883_s22, %s1872_s26  ;;  %s1625_s25 = smov [#allocation8]  }
 0x391   : > { %p1550_p4 = scmp.ne.s32.totalorder %s1883_s22, %s1549_s19  ;;  %s1553_s30 = sshll.u32 %s1625_s25, 4  ;;  %s1554_s30 = int_to_ptr.vmem [resolvable:$false] %s1553_s30 }
 0x392   : > { %s1555_s21 = scalar_lea.vmem %s1554_s30, 512  ;;  %p1556_p11 = scmp.lt.s32.totalorder %s1883_s22, %s1554_s30 }
 0x393   : > { %p1551_p7 = pnand %p1550_p4, %p1235_p2  ;;  %p1557_p0 = scmp.lt.s32.totalorder %s1555_s21, %s1549_s19 }
 0x395   : > { %p1552_p8 = pneg %p1551_p7  ;;  %p1558_p6 = por %p1557_p0, %p1556_p11 }
 0x397   : > { %p1559_p9 = pnand %p1558_p6, %p1552_p8 }
 0x399   : > { %1562 = shalt.err (!%p1559_p9)
}
 0x39a   : > { %s1563_s16 = scalar_lea.hbm %s1881_s27, %s1872_s26  ;;  %s1567_s29 = scalar_lea.hbm %s1937_s11, 320 }
 0x39b   : > { %p1564_p13 = scmp.ne.s32.totalorder %s1881_s27, %s1563_s16  ;;  %p1568_p12 = scmp.lt.s32.totalorder %s1881_s27, %s1937_s11 }
 0x39c   : > { %p1569_p10 = scmp.lt.s32.totalorder %s1567_s29, %s1563_s16 }
 0x39d   : > { %p1565_p1 = pnand %p1564_p13, %p1235_p2 }
 0x39e   : > { %p1570_p3 = por %p1569_p10, %p1568_p12 }
 0x39f   : > { %p1566_p5 = pneg %p1565_p1 }
 0x3a1   : > { %p1571_p4 = pnand %p1570_p3, %p1566_p5 }
 0x3a3   : > { %1574 = shalt.err (!%p1571_p4)
}
 0x3a4   : > { %s1626_s19 = smov 64   ;;  %s1627_s25 = smov 4  }
 0x3a5   : > { %1079 = dma.vmem_to_hbm [thread:$0]  (%p1235_p2), %s1883_s22, %s1872_s26, %s1881_s27, %s1867_s24, %s1626_s19, %s1626_s19, %s1627_s25  }
 0x3a6 PF: > { %p1403_p7 = scmp.ge.s32.totalorder %s1617_s20, 2  ;;  %s1088_s30 = sand.u32 1, %s1605_s17  }
 0x3a7   : > { %p1951_p8 = scmp.ne.s32.totalorder %s1943_s28, 0  ;;  %s1089_s21 = scalar_lea.sflag [#allocation4], %s1088_s30 }
 0x3a9   : > { %p1394_p11 = pnand %p1403_p7, %p1951_p8 }
 0x3ab   : > { %p1395_p0 = pneg %p1394_p11 }
 0x3ad   : > { %1600 = dma.done.wait (%p1395_p0), %s1089_s21, 256  }
 0x3ae   : > { %1602 = vsyncadd (%p1395_p0), %s1089_s21, 4294967040  ;;  %s1952_s16 = sld [smem:[#allocation12_spill]]  ;;  %p23_p6 = scmp.ge.s32.totalorder %s1713_s23, 4  }
 0x3af   : > { %s1953_s19 = sld [smem:[#allocation13_spill]]  ;;  %s1954_s17 = smov %s1609_s18 }
 0x3b0   : > { %s1956_s20 = smov %s1713_s23  ;;  %25 = sbr.rel (!%p23_p6) target bundleno = 5 (0x5), region = 115 }
 0x3b4   : > { %s1955_s18 = smov %s1952_s16 }
 0x3b5   :  { %1094 = vsyncpa [#allocation3], 1 }
 0x3b6   :  { %1096 = vsyncpa [#allocation3 + $0x1], 1 }
 0x3b7   :  { %1097 = vsyncpa [#allocation6], 1 }
 0x3b8   :  { %1098 = vsyncpa [#allocation4], 1 }
 0x3b9   :  { %1100 = vsyncpa [#allocation4 + $0x1], 1 }

</bundles_post_ra>
